<compile_context>
chip_gen: v7x
topology: tpu7x:2x2x1
jax: 0.10.0
libtpu: 0.0.40
codegen_flags: <defaults>
</compile_context>

<pallas_src>
import functools

import jax
import jax.numpy as jnp
from jax import lax
from jax.experimental import pallas as pl
from jax.experimental.pallas import tpu as pltpu

_LANES = 128


def _tpu_generation():
    try:
        kind = jax.devices()[0].device_kind.lower()
    except Exception:
        return 0
    for gen in (7, 6, 5, 4):
        if f"v{gen}" in kind or f"tpu{gen}" in kind:
            return gen
    return 0


def _hw_params():
    """(num_splits, block_rows) tuned per TPU generation (HBM-bound streaming)."""
    gen = _tpu_generation()
    if gen >= 7:
        return 2, 8192      # 2 TCs, 3.2 TB/s HBM: 4 MiB/input/step, 2-way split
    if gen == 6:
        return 1, 4096      # single TC, 2 MiB/input/step (~85% of HBM roofline)
    return 1, 2048          # v5e / unknown: 1 MiB/input/step, fits 16 MiB scoped VMEM


def _partial_sum(x):
    # (block_rows, 128) -> (1, 128): multi-vreg VALU adds + one cheap XLU
    # cross-sublane reduce; keeps the accumulator a single vreg row.
    return jnp.sum(x, axis=0, keepdims=True)


def _rmsle_unmasked_kernel(pred_ref, target_ref, out_ref, acc_ref, *,
                           bps, block_rows, total_rows, edge_start, needs_row_mask):
    c = pl.program_id(0)
    j = pl.program_id(1)

    @pl.when(j == 0)
    def _init():
        acc_ref[...] = jnp.zeros_like(acc_ref)

    p = jnp.log1p(pred_ref[...].astype(jnp.float32))
    t = jnp.log1p(target_ref[...].astype(jnp.float32))
    d = p - t
    sq = d * d

    if needs_row_mask:                          # static python bool
        g = c * bps + j                         # logical (unclamped) block index

        @pl.when(g < edge_start)
        def _fast():
            acc_ref[...] += _partial_sum(sq)

        @pl.when(g >= edge_start)
        def _edge():                            # partial tail block / clamped duplicates
            row = g * block_rows + lax.broadcasted_iota(
                jnp.int32, (block_rows, _LANES), 0)
            acc_ref[...] += _partial_sum(jnp.where(row < total_rows, sq, 0.0))
    else:
        acc_ref[...] += _partial_sum(sq)

    @pl.when(j == pl.num_programs(1) - 1)
    def _finalize():
        out_ref[0] = acc_ref[...]


def _rmsle_masked_kernel(pred_ref, target_ref, mask_ref, sq_out_ref, m_out_ref,
                         acc_sq_ref, acc_m_ref, *,
                         bps, block_rows, total_rows, edge_start, needs_row_mask):
    c = pl.program_id(0)
    j = pl.program_id(1)

    @pl.when(j == 0)
    def _init():
        acc_sq_ref[...] = jnp.zeros_like(acc_sq_ref)
        acc_m_ref[...] = jnp.zeros_like(acc_m_ref)

    p = jnp.log1p(pred_ref[...].astype(jnp.float32))
    t = jnp.log1p(target_ref[...].astype(jnp.float32))
    d = p - t
    sq = d * d
    m = mask_ref[...].astype(jnp.float32)

    def _accumulate(mm):
        # numerator: unweighted selection where mask != 0 (matches pred[mask.bool()]);
        # denominator: sum of original mask values (matches mask.sum()).
        acc_sq_ref[...] += _partial_sum(jnp.where(mm != 0.0, sq, 0.0))
        acc_m_ref[...] += _partial_sum(mm)

    if needs_row_mask:
        g = c * bps + j

        @pl.when(g < edge_start)
        def _fast():
            _accumulate(m)

        @pl.when(g >= edge_start)
        def _edge():
            row = g * block_rows + lax.broadcasted_iota(
                jnp.int32, (block_rows, _LANES), 0)
            _accumulate(jnp.where(row < total_rows, m, 0.0))
    else:
        _accumulate(m)

    @pl.when(j == pl.num_programs(1) - 1)
    def _finalize():
        sq_out_ref[0] = acc_sq_ref[...]
        m_out_ref[0] = acc_m_ref[...]


def _tail_sums(pred_f, target_f, mask_f, has_mask):
    """Plain-jnp contribution of a small (<=127 element) slice."""
    p = jnp.log1p(pred_f.astype(jnp.float32))
    t = jnp.log1p(target_f.astype(jnp.float32))
    sq = (p - t) ** 2
    if has_mask:
        m = mask_f.astype(jnp.float32)
        return jnp.sum(jnp.where(m != 0.0, sq, 0.0)), jnp.sum(m)
    return jnp.sum(sq), None


@functools.partial(jax.jit, static_argnames=("has_mask",))
def _rmsle_call(pred, target, mask, has_mask):
    n = pred.size                                   # static under jit
    num_splits_hw, block_rows_hw = _hw_params()

    pred_f = pred.reshape(-1)
    target_f = target.reshape(-1)
    if has_mask:
        # Bool -> exact 0/1 int8 stream; wider int / float masks pass through so
        # large integer weights never wrap and fractional weights keep exact sums.
        # TODO(synk): feed bool masks straight through (drop the astype HBM pass)
        # once bool pallas inputs are verified on the target jaxlib.
        mask_f = (mask.astype(jnp.int8) if mask.dtype == jnp.bool_ else mask).reshape(-1)
    else:
        mask_f = None

    tail = n % _LANES
    aligned = n - tail

    if aligned == 0:
        # Fewer than 128 elements: plain jnp is simpler and faster than a kernel.
        sq_sum, m_sum = _tail_sums(pred_f, target_f, mask_f, has_mask)
        denom = m_sum if has_mask else jnp.float32(n)
        return jnp.sqrt(sq_sum / denom)

    # <=127-element ragged tail with plain jnp; no full-array jnp.pad copy.
    tail_sq = jnp.float32(0.0)
    tail_m = jnp.float32(0.0)
    if tail:
        tail_sq, tm = _tail_sums(pred_f[aligned:], target_f[aligned:],
                                 mask_f[aligned:] if has_mask else None, has_mask)
        if has_mask:
            tail_m = tm
        pred_f, target_f = pred_f[:aligned], target_f[:aligned]
        if has_mask:
            mask_f = mask_f[:aligned]

    rows = aligned // _LANES
    pred_t = pred_f.reshape(rows, _LANES)           # zero-copy when tail == 0
    target_t = target_f.reshape(rows, _LANES)

    block_rows = min(block_rows_hw, rows)
    num_blocks = -(-rows // block_rows)
    num_splits = min(num_splits_hw, num_blocks)
    bps = -(-num_blocks // num_splits)              # blocks per split (reduction axis)
    # First logical block index needing element-validity masking: the partial tail
    # block (if any) and the clamped duplicate blocks created by the split.
    edge_start = num_blocks - 1 if rows % block_rows else num_blocks
    needs_row_mask = edge_start < num_splits * bps

    if num_splits * bps == num_blocks:              # exact cover: no index clamp
        def data_index(c, j):
            return (c * bps + j, 0)
    else:
        def data_index(c, j):
            # Clamp so overflow iterations of the split re-read a valid block; their
            # contribution is zeroed in-kernel by the edge mask.
            return (jnp.minimum(c * bps + j, num_blocks - 1), 0)

    data_spec = pl.BlockSpec((block_rows, _LANES), data_index)
    out_spec = pl.BlockSpec((1, 1, _LANES), lambda c, j: (c, 0, 0))
    part_shape = jax.ShapeDtypeStruct((num_splits, 1, _LANES), jnp.float32)
    acc = pltpu.VMEM((1, _LANES), jnp.float32)      # single-vreg-row accumulator
    cparams = pltpu.CompilerParams(dimension_semantics=("parallel", "arbitrary"))
    static = dict(bps=bps, block_rows=block_rows, total_rows=rows,
                  edge_start=edge_start, needs_row_mask=needs_row_mask)

    if has_mask:
        mask_t = mask_f.reshape(rows, _LANES)
        sq_parts, m_parts = pl.pallas_call(
            functools.partial(_rmsle_masked_kernel, **static),
            out_shape=(part_shape, part_shape),
            grid_spec=pltpu.PrefetchScalarGridSpec(
                num_scalar_prefetch=0,
                grid=(num_splits, bps),
                in_specs=[data_spec, data_spec, data_spec],
                out_specs=[out_spec, out_spec],
                scratch_shapes=[acc, acc],
            ),
            compiler_params=cparams,
        )(pred_t, target_t, mask_t)
        return jnp.sqrt((jnp.sum(sq_parts) + tail_sq) / (jnp.sum(m_parts) + tail_m))

    parts = pl.pallas_call(
        functools.partial(_rmsle_unmasked_kernel, **static),
        out_shape=part_shape,
        grid_spec=pltpu.PrefetchScalarGridSpec(
            num_scalar_prefetch=0,
            grid=(num_splits, bps),
            in_specs=[data_spec, data_spec],
            out_specs=out_spec,
            scratch_shapes=[acc],
        ),
        compiler_params=cparams,
    )(pred_t, target_t)
    return jnp.sqrt((jnp.sum(parts) + tail_sq) / n)


def rmsle_loss(pred, target, mask=None):
    """Pallas-backed RMSLE loss. `mask` may be None, bool, int, or float."""
    if mask is None:
        return _rmsle_call(pred, target, pred, False)   # dummy operand (unused/DCE'd)
    return _rmsle_call(pred, target, mask, True)


def _rmsle_ref(pred, target, mask=None):
    p = jnp.log1p(pred.astype(jnp.float32))
    t = jnp.log1p(target.astype(jnp.float32))
    if mask is None:
        return jnp.sqrt(jnp.mean((p - t) ** 2))
    m = mask.astype(jnp.float32)
    sq = jnp.where(m != 0.0, (p - t) ** 2, 0.0)
    return jnp.sqrt(jnp.sum(sq) / jnp.sum(m))


if __name__ == "__main__":
    key = jax.random.PRNGKey(0)

    def check(shape, seed_key, dtype=jnp.float32, mask_dtype=jnp.bool_,
              rtol=1e-5, atol=1e-6):
        k1, k2, k3 = jax.random.split(seed_key, 3)
        # RMSLE assumes non-negative predictions/targets (log1p domain).
        pred = jax.random.uniform(k1, shape, jnp.float32, 0.0, 5.0).astype(dtype)
        target = jax.random.uniform(k2, shape, jnp.float32, 0.0, 5.0).astype(dtype)
        mask = (jax.random.uniform(k3, shape) > 0.5).astype(mask_dtype)

        got_u = jax.block_until_ready(rmsle_loss(pred, target))
        got_m = jax.block_until_ready(rmsle_loss(pred, target, mask))
        ref_u = _rmsle_ref(pred, target)
        ref_m = _rmsle_ref(pred, target, mask)
        assert jnp.allclose(got_u, ref_u, rtol=rtol, atol=atol), (shape, got_u, ref_u)
        assert jnp.allclose(got_m, ref_m, rtol=rtol, atol=atol), (shape, got_m, ref_m)

    keys = jax.random.split(key, 5)
    check((2, 4, 16, 16), keys[0])                    # NCHW example (lane-aligned)
    check((2, 3, 40), keys[1])                        # ragged tail (n % 128 != 0)
    check((2, 3, 7), keys[2])                         # tiny (<128 elems): pure-jnp path
    check((4, 8, 128, 128), keys[3], rtol=1e-4)       # multi-block grid accumulation
    check((2, 4, 16, 16), keys[4], dtype=jnp.bfloat16,  # narrow dtype stays narrow in HBM
          mask_dtype=jnp.int32, rtol=1e-4, atol=1e-5)

    print("KERNEL_OK")
</pallas_src>

<mosaic_0001>
module attributes {stable_mosaic.version = 11 : i64} {
  func.func @_rmsle_unmasked_kernel(%arg0: i32, %arg1: i32, %arg2: memref<16x128xf32, #tpu.memory_space<vmem>>, %arg3: memref<16x128xf32, #tpu.memory_space<vmem>>, %arg4: memref<1x1x128xf32, #tpu.memory_space<vmem>>, %arg5: memref<1x128xf32, #tpu.memory_space<vmem>>) attributes {dimension_semantics = [#tpu.dimension_semantics<parallel>, #tpu.dimension_semantics<arbitrary>], iteration_bounds = array<i64: 1, 1>, scalar_prefetch = 0 : i64, scratch_operands = 1 : i64, tpu.core_type = #tpu.core_type<tc>, window_params = [{transform_indices = @transform_0, window_bounds = array<i64: 16, 128>}, {transform_indices = @transform_1, window_bounds = array<i64: 16, 128>}, {transform_indices = @transform_2, window_bounds = array<i64: 1, 1, 128>}]} {
    %c0_i32 = arith.constant 0 : i32
    %0 = arith.cmpi eq, %arg1, %c0_i32 : i32
    %1 = arith.extui %0 : i1 to i32
    %c0_i32_0 = arith.constant 0 : i32
    %2 = arith.cmpi ne, %1, %c0_i32_0 : i32
    scf.if %2 {
      %cst_10 = arith.constant 0.000000e+00 : f32
      %17 = vector.broadcast %cst_10 : f32 to vector<1x128xf32>
      %c0_11 = arith.constant 0 : index
      %c0_12 = arith.constant 0 : index
      %18 = vector.load %arg5[%c0_11, %c0_12] : memref<1x128xf32, #tpu.memory_space<vmem>>, vector<1x128xf32>
      tpu.vector_store %arg5[%c0_11, %c0_12], %17 {strides = array<i32>} : memref<1x128xf32, #tpu.memory_space<vmem>>, vector<1x128xf32>,
    } else {
    }
    %c0 = arith.constant 0 : index
    %c0_1 = arith.constant 0 : index
    %3 = vector.load %arg2[%c0, %c0_1] : memref<16x128xf32, #tpu.memory_space<vmem>>, vector<16x128xf32>
    %4 = math.log1p %3 : vector<16x128xf32>
    %c0_2 = arith.constant 0 : index
    %c0_3 = arith.constant 0 : index
    %5 = vector.load %arg3[%c0_2, %c0_3] : memref<16x128xf32, #tpu.memory_space<vmem>>, vector<16x128xf32>
    %6 = math.log1p %5 : vector<16x128xf32>
    %7 = arith.subf %4, %6 : vector<16x128xf32>
    %8 = arith.mulf %7, %7 : vector<16x128xf32>
    %c0_4 = arith.constant 0 : index
    %c0_5 = arith.constant 0 : index
    %9 = vector.load %arg5[%c0_4, %c0_5] : memref<1x128xf32, #tpu.memory_space<vmem>>, vector<1x128xf32>
    %cst = arith.constant dense<0.000000e+00> : vector<128xf32>
    %10 = vector.multi_reduction <add>, %8, %cst [0] : vector<16x128xf32> to vector<128xf32>
    %11 = vector.shape_cast %10 : vector<128xf32> to vector<1x128xf32>
    %12 = arith.addf %9, %11 : vector<1x128xf32>
    %c0_6 = arith.constant 0 : index
    %c0_7 = arith.constant 0 : index
    %13 = vector.load %arg5[%c0_6, %c0_7] : memref<1x128xf32, #tpu.memory_space<vmem>>, vector<1x128xf32>
    tpu.vector_store %arg5[%c0_6, %c0_7], %12 {strides = array<i32>} : memref<1x128xf32, #tpu.memory_space<vmem>>, vector<1x128xf32>,
    %c0_i32_8 = arith.constant 0 : i32
    %14 = arith.cmpi eq, %arg1, %c0_i32_8 : i32
    %15 = arith.extui %14 : i1 to i32
    %c0_i32_9 = arith.constant 0 : i32
    %16 = arith.cmpi ne, %15, %c0_i32_9 : i32
    scf.if %16 {
      %c0_10 = arith.constant 0 : index
      %c0_11 = arith.constant 0 : index
      %17 = vector.load %arg5[%c0_10, %c0_11] : memref<1x128xf32, #tpu.memory_space<vmem>>, vector<1x128xf32>
      %c0_12 = arith.constant 0 : index
      %c0_13 = arith.constant 0 : index
      %c0_14 = arith.constant 0 : index
      %18 = vector.load %arg4[%c0_12, %c0_13, %c0_14] : memref<1x1x128xf32, #tpu.memory_space<vmem>>, vector<1x1x128xf32>
      %19 = vector.shape_cast %18 : vector<1x1x128xf32> to vector<1x128xf32>
      %20 = vector.shape_cast %17 : vector<1x128xf32> to vector<1x1x128xf32>
      tpu.vector_store %arg4[%c0_12, %c0_13, %c0_14], %20 {strides = array<i32>} : memref<1x1x128xf32, #tpu.memory_space<vmem>>, vector<1x1x128xf32>,
    } else {
    }
    return
  }
  func.func @transform_0(%arg0: i32, %arg1: i32) -> (i32, i32) {
    %c1_i32 = arith.constant 1 : i32
    %0 = arith.muli %arg0, %c1_i32 : i32
    %1 = arith.addi %0, %arg1 : i32
    %c0_i32 = arith.constant 0 : i32
    %c0_i32_0 = arith.constant 0 : i32
    return %1, %c0_i32 : i32, i32
  }
  func.func @transform_1(%arg0: i32, %arg1: i32) -> (i32, i32) {
    %c1_i32 = arith.constant 1 : i32
    %0 = arith.muli %arg0, %c1_i32 : i32
    %1 = arith.addi %0, %arg1 : i32
    %c0_i32 = arith.constant 0 : i32
    %c0_i32_0 = arith.constant 0 : i32
    return %1, %c0_i32 : i32, i32
  }
  func.func @transform_2(%arg0: i32, %arg1: i32) -> (i32, i32, i32) {
    %c0_i32 = arith.constant 0 : i32
    %c0_i32_0 = arith.constant 0 : i32
    %c0_i32_1 = arith.constant 0 : i32
    return %arg0, %c0_i32, %c0_i32_0 : i32, i32, i32
  }
}

</mosaic_0001>

<bundles_post_ra>
// kernel: _rmsle_call.1
= control target key start
LH: loop header
LB: loop body
LE: loop exit
PB: predicated region body
PF: predicated region fallthrough
CT: control target
= control target key end

     0   :  { %v144_v0 = vmov 0.0   ;;  %s181_s0 = inlined_call_operand.vmem [shape: f32[16,128], index: 0, kind: input, shape index: {}]   ;;  %s182_s1 = inlined_call_operand.vmem [shape: f32[16,128], index: 1, kind: input, shape index: {}]   ;;  %s183_s2 = inlined_call_operand.vmem [shape: f32[1,1,128], index: 2, kind: output, shape index: {}]  }
   0x1   :  { %59 = vst [vmem:[#allocation2] sm:$0x1] %v144_v0  ;;  %v60_v1 = vld [vmem:[%s181_s0] sm:$0xff]  ;;  %v61_v2 = vld [vmem:[%s181_s0 + $0x8] sm:$0xff] }
   0x2   :  { %v80_v3 = vld [vmem:[%s182_s1] sm:$0xff]  ;;  %v62_v4 = vadd.f32 1.0, %v60_v1  ;;  %v71_v5 = vadd.f32 1.0, %v61_v2  ;;  %v81_v6 = vld [vmem:[%s182_s1 + $0x8] sm:$0xff]  ;;  %v65_v8 = vmul.f32 -0.5, %v60_v1  ;;  %v74_v10 = vmul.f32 -0.5, %v61_v2 }
   0x3   :  { %v82_v7 = vadd.f32 1.0, %v80_v3  ;;  %v91_v9 = vadd.f32 1.0, %v81_v6  ;;  %v85_v11 = vmul.f32 -0.5, %v80_v3  ;;  %v94_v13 = vmul.f32 -0.5, %v81_v6 }
   0x4   :  { %136 = vlog2.f32 %v62_v4  ;;  %v66_v12 = vadd.f32 1.0, %v65_v8  ;;  %v68_v14 = vand.u32 2147483647, %v60_v1  ;;  %v75_v15 = vadd.f32 1.0, %v74_v10 }
   0x5   :  { %138 = vlog2.f32 %v71_v5  ;;  %v86_v16 = vadd.f32 1.0, %v85_v11  ;;  %v77_v17 = vand.u32 2147483647, %v61_v2  ;;  %v88_v18 = vand.u32 2147483647, %v80_v3 }
   0x6   :  { %140 = vlog2.f32 %v82_v7  ;;  %v67_v19 = vmul.f32 %v66_v12, %v60_v1  ;;  %v95_v20 = vadd.f32 1.0, %v94_v13  ;;  %vm172_vm0 = vcmp.lt.f32.partialorder %v68_v14, 0.0004427343 }
   0x7   :  { %142 = vlog2.f32 %v91_v9  ;;  %v97_v23 = vand.u32 2147483647, %v81_v6  ;;  %v76_v26 = vmul.f32 %v75_v15, %v61_v2  ;;  %v87_v27 = vmul.f32 %v86_v16, %v80_v3 }
   0x8   :  { %vm78_vm1 = vcmp.lt.f32.partialorder %v77_v17, 0.0004427343  ;;  %vm89_vm2 = vcmp.lt.f32.partialorder %v88_v18, 0.0004427343  ;;  %v96_v32 = vmul.f32 %v95_v20, %v81_v6  ;;  %v104_v48 = vld [vmem:[#allocation2] sm:$0x1] }
   0x9   :  { %vm98_vm3 = vcmp.lt.f32.partialorder %v97_v23, 0.0004427343 }
   0xe   :  { %v137_v21 = vpop.eup %136 }
   0xf   :  { %v139_v24 = vpop.eup %138  ;;  %v64_v25 = vmul.f32 0.6931472, %v137_v21 }
  0x10   :  { %v141_v28 = vpop.eup %140  ;;  %v73_v29 = vmul.f32 0.6931472, %v139_v24 }
  0x11   :  { %v70_v30 = vsel %vm172_vm0, %v67_v19, %v64_v25  ;;  %v84_v31 = vmul.f32 0.6931472, %v141_v28  ;;  %v143_v33 = vpop.eup %142 }
  0x12   :  { %v79_v34 = vsel %vm78_vm1, %v76_v26, %v73_v29  ;;  %v93_v36 = vmul.f32 0.6931472, %v143_v33 }
  0x13   :  { %v90_v35 = vsel %vm89_vm2, %v87_v27, %v84_v31 }
  0x14   :  { %v100_v37 = vsub.f32 %v70_v30, %v90_v35  ;;  %v99_v38 = vsel %vm98_vm3, %v96_v32, %v93_v36 }
  0x15   :  { %v101_v39 = vsub.f32 %v79_v34, %v99_v38 }
  0x16   :  { %v102_v40 = vmul.f32 %v100_v37, %v100_v37 }
  0x17   :  { %v103_v41 = vmul.f32 %v101_v39, %v101_v39 }
  0x19   :  { %v105_v42 = vadd.f32 %v103_v41, %v102_v40 }
  0x1b   :  { %v106_v43 = vrot.slane %v105_v42, 4 }
  0x1d   :  { %v107_v44 = vadd.f32 %v106_v43, %v105_v42 }
  0x1f   :  { %v108_v45 = vrot.slane %v107_v44, 2 }
  0x21   :  { %v109_v46 = vadd.f32 %v108_v45, %v107_v44 }
  0x23   :  { %v110_v47 = vrot.slane %v109_v46, 1 }
  0x25   :  { %v111_v49 = vadd.f32 %v110_v47, %v109_v46 }
  0x27   :  { %v112_v50 = vadd.f32 %v111_v49, %v104_v48 }
  0x29   :  { %113 = vst [vmem:[#allocation2] sm:$0x1] %v112_v50 }
  0x30   :  { %v117_v51 = vld [vmem:[#allocation2] sm:$0x1] }
  0x31   :  { %118 = vst [vmem:[%s183_s2] sm:$0x1] %v117_v51 }

</bundles_post_ra>
